<compile_context>
chip_gen: v7x
topology: tpu7x:2x2x1
jax: 0.10.0
libtpu: 0.0.40
codegen_flags: <defaults>
</compile_context>

<pallas_src>
import jax
import jax.numpy as jnp
from jax import lax
from jax.experimental import pallas as pl
from jax.experimental.pallas import tpu as pltpu

EPS = 1e-12  # F.normalize default eps


def _make_kernel(s_tile, s_valid, s_pad, normalize_input):
    """Builds the kernel closure for a given spatial tiling."""
    use_mask = s_valid < s_pad  # static: only emit masking if padding exists

    def kernel(x_ref, w_ref, b_ref, cent_ref, out_ref, acc_ref, asum_ref):
        # x_ref:    (C, S_TILE) bf16  one spatial tile of one image (batch squeezed)
        # w_ref:    (K, C) f32        1x1 conv weight
        # b_ref:    (K, 1) f32        conv bias
        # cent_ref: (K, C) f32        centroids
        # out_ref:  (K, C) f32        VLAD descriptor for this image
        # acc_ref:  (K, C) f32        VMEM accumulator: sum_s a[k,s]*xn[c,s]
        # asum_ref: (K, 1) f32        VMEM accumulator: sum_s a[k,s]
        s = pl.program_id(1)

        @pl.when(s == 0)
        def _():
            acc_ref[...] = jnp.zeros_like(acc_ref)
            asum_ref[...] = jnp.zeros_like(asum_ref)

        x_bf = x_ref[...]                        # (C, St) bf16 (HBM stream)
        x = x_bf.astype(jnp.float32)

        inv_c = None
        if normalize_input:
            # Per-pixel 1/||x||_2 over channels.  It is a per-column scale, so
            # it commutes through the channel contraction and is folded into
            # the small (K,St)/(1,St) tensors below instead of scaling the big
            # (C,St) activation (no xn temporary is materialized).
            sq = jnp.sum(x * x, axis=0, keepdims=True)            # (1, St)
            inv_c = lax.rsqrt(jnp.maximum(sq, EPS * EPS))         # exact rsqrt

        # --- 1x1 conv logits, kept in f32 (alpha-scaled weights; MXU has slack)
        logits = jnp.dot(w_ref[...], x, preferred_element_type=jnp.float32)  # (K,St)
        if normalize_input:
            logits = logits * inv_c
        logits = logits + b_ref[...]

        # --- softmax over clusters (axis 0) ---------------------------------
        m = jnp.max(logits, axis=0, keepdims=True)
        e = jnp.exp(logits - m)
        inv_den = pl.reciprocal(jnp.sum(e, axis=0, keepdims=True), approx=True)
        a = e * inv_den                                           # (K, St)

        if use_mask:
            # Zero out soft-assignments of padded (beyond H*W) columns.
            col = lax.broadcasted_iota(jnp.int32, a.shape, 1) + s * s_tile
            a = jnp.where(col < s_valid, a, 0.0)

        # --- accumulate VLAD terms:
        #   vlad[k,c] = sum_s a[k,s]*xn[c,s] - cent[k,c]*sum_s a[k,s]
        asum_ref[...] += jnp.sum(a, axis=1, keepdims=True)        # (K, 1)
        a_res = a * inv_c if normalize_input else a               # fold 1/||x||
        acc_ref[...] += lax.dot_general(
            a_res.astype(jnp.bfloat16), x_bf,
            dimension_numbers=(((1,), (1,)), ((), ())),           # contract S
            preferred_element_type=jnp.float32)                   # (K, C)

        @pl.when(s == pl.num_programs(1) - 1)
        def _():
            v = acc_ref[...] - cent_ref[...] * asum_ref[...]      # (K, C)

            # intra-normalization: F.normalize(vlad, p=2, dim=2) over channels
            isq = jnp.sum(v * v, axis=1, keepdims=True)           # (K, 1)
            v = v * lax.rsqrt(jnp.maximum(isq, EPS * EPS))        # exact, 1x/image

            # global L2 normalization over the flattened (K*C) descriptor
            gsq = jnp.sum(jnp.sum(v * v, axis=1, keepdims=True),
                          axis=0, keepdims=True)                  # (1, 1)
            out_ref[...] = v * lax.rsqrt(jnp.maximum(gsq, EPS * EPS))

    return kernel


def _vmem_budget():
    """Returns (physical VMEM bytes, per-buffer x-tile budget bytes)."""
    phys = 64 * 1024 * 1024  # conservative fallback (v7x per-core VMEM)
    try:
        info = pltpu.get_tpu_info()
        v = getattr(info, "vmem_capacity_bytes", None)
        if v:
            phys = int(v)
    except Exception:
        pass
    # ~1/8 of physical VMEM per x buffer: 16 MiB on 128-MiB chips (v5e/v6e),
    # 8 MiB on v7x; never below 2 MiB.
    x_buf = min(16 * 1024 * 1024, max(2 * 1024 * 1024, phys // 8))
    return phys, x_buf


def netvlad_forward(x_nchw, weight, bias, centroids, normalize_input=True,
                    s_tile=None):
    """x_nchw: (N, C, H, W). Returns (N, C, K), exactly like the PyTorch .view."""
    N, C, H, W = x_nchw.shape
    K = centroids.shape[0]
    S = H * W

    phys_vmem, x_buf_budget = _vmem_budget()

    # ---- spatial tiling: lane-dense (multiple of 128), bytes-budgeted so that
    # typical feature maps fit in a single spatial tile per image -------------
    x_itemsize = 2  # x is streamed as bf16
    budget_cols = max(128, ((x_buf_budget // (C * x_itemsize)) // 128) * 128)
    if s_tile is None:
        s_tile_req = budget_cols
    else:
        s_tile_req = min(budget_cols, max(128, (int(s_tile) // 128) * 128))
    s_pad128 = ((S + 127) // 128) * 128
    S_TILE = min(s_pad128, s_tile_req)
    S_pad = ((S + S_TILE - 1) // S_TILE) * S_TILE
    num_s = S_pad // S_TILE

    x = x_nchw.reshape(N, C, S).astype(jnp.bfloat16)
    if S_pad != S:
        x = jnp.pad(x, ((0, 0), (0, 0), (0, S_pad - S)))

    w = weight.reshape(K, C).astype(jnp.float32)   # accepts (K,C) or (K,C,1,1)
    b2d = bias.reshape(K, 1).astype(jnp.float32)
    cent = centroids.astype(jnp.float32)

    kernel = _make_kernel(S_TILE, S, S_pad, normalize_input)

    # Explicit VMEM limit: double-buffered x tile + resident params/outputs.
    x_tile_bytes = C * S_TILE * x_itemsize
    small_bytes = 2 * (2 * K * C + K) * 4 + 2 * K * C * 4 + (K * C + K) * 4
    need = 2 * x_tile_bytes + small_bytes
    vmem_limit = int(min(phys_vmem * 3 // 4,
                         max(32 * 1024 * 1024, need + (8 << 20))))

    cost = pl.CostEstimate(
        flops=int(N * (4 * K * C * S_pad + 2 * C * S_pad + 8 * K * S_pad)),
        transcendentals=int(N * (K + 2) * S_pad),
        bytes_accessed=int(x_itemsize * N * C * S_pad
                           + 4 * (N * K * C + 2 * K * C + K)),
    )

    out = pl.pallas_call(
        kernel,
        out_shape=jax.ShapeDtypeStruct((N, K, C), jnp.float32),
        grid_spec=pltpu.PrefetchScalarGridSpec(
            num_scalar_prefetch=0,
            grid=(N, num_s),
            in_specs=[
                pl.BlockSpec((pl.Squeezed(), C, S_TILE), lambda n, s: (n, 0, s)),
                pl.BlockSpec((K, C), lambda n, s: (0, 0)),
                pl.BlockSpec((K, 1), lambda n, s: (0, 0)),
                pl.BlockSpec((K, C), lambda n, s: (0, 0)),
            ],
            out_specs=pl.BlockSpec((pl.Squeezed(), K, C), lambda n, s: (n, 0, 0)),
            scratch_shapes=[
                pltpu.VMEM((K, C), jnp.float32),   # residual accumulator
                pltpu.VMEM((K, 1), jnp.float32),   # soft-assignment mass
            ],
        ),
        compiler_params=pltpu.CompilerParams(
            dimension_semantics=("parallel", "arbitrary"),
            vmem_limit_bytes=vmem_limit),
        cost_estimate=cost,
    )(x, w, b2d, cent)

    # PyTorch: vlad.view(N, -1) then .view(N, channel, cluster) — a raw
    # reinterpretation of the (N, K*C) buffer as (N, C, K), NOT a transpose.
    return out.reshape(N, K * C).reshape(N, C, K)


def netvlad_reference(x_nchw, weight, bias, centroids):
    """Pure-JAX f32 reference mirroring the PyTorch module exactly."""
    N, C, H, W = x_nchw.shape
    K = centroids.shape[0]
    hi = lax.Precision.HIGHEST
    x = x_nchw.reshape(N, C, H * W).astype(jnp.float32)
    xn = x / jnp.maximum(jnp.linalg.norm(x, axis=1, keepdims=True), EPS)
    w = weight.reshape(K, C).astype(jnp.float32)
    logits = jnp.einsum("kc,ncs->nks", w, xn, precision=hi) + bias.reshape(1, K, 1)
    a = jax.nn.softmax(logits, axis=1)                            # (N, K, S)
    vlad = (jnp.einsum("nks,ncs->nkc", a, xn, precision=hi)
            - centroids[None, :, :] * jnp.sum(a, axis=-1)[..., None])
    vlad = vlad / jnp.maximum(jnp.linalg.norm(vlad, axis=2, keepdims=True), EPS)
    flat = vlad.reshape(N, -1)
    flat = flat / jnp.maximum(jnp.linalg.norm(flat, axis=1, keepdims=True), EPS)
    return flat.reshape(N, C, K)


if __name__ == "__main__":
    # Small NetVLAD-consistent shapes: batch=2, dim(C)=32, clusters(K)=8,
    # 14x14 spatial (S=196 -> padded to 256: masking path always exercised;
    # the forced s_tile=128 run also exercises multi-tile accumulation).
    N, C, K, H, W = 2, 32, 8, 14, 14
    alpha = 100.0

    key = jax.random.PRNGKey(0)
    kx, kc = jax.random.split(key)

    x = jax.random.normal(kx, (N, C, H, W), dtype=jnp.float32)
    # The kernel streams x as bf16; quantize once so kernel and reference see
    # identical inputs and the comparison isolates kernel arithmetic.
    x = x.astype(jnp.bfloat16).astype(jnp.float32)

    # Parameter init mirroring the module's __init__/_init_params:
    # centroids ~ U[0,1), conv.weight = 2*alpha*centroids,
    # conv.bias = -alpha * ||centroids||_2 (per cluster).
    centroids = jax.random.uniform(kc, (K, C), dtype=jnp.float32)
    weight = 2.0 * alpha * centroids                            # (K, C)
    bias = -alpha * jnp.sqrt(jnp.sum(centroids ** 2, axis=1))   # (K,)

    ref = netvlad_reference(x, weight, bias, centroids)

    out_auto = jax.block_until_ready(
        netvlad_forward(x, weight, bias, centroids))            # 1 spatial tile
    out_tiled = jax.block_until_ready(
        netvlad_forward(x, weight, bias, centroids, s_tile=128))  # 2 tiles

    for out in (out_auto, out_tiled):
        assert out.shape == (N, C, K)
        assert bool(jnp.all(jnp.isfinite(out)))
        err = float(jnp.max(jnp.abs(out - ref)))
        assert err < 3e-3, f"max abs error vs reference: {err}"

    norms = jnp.sqrt(jnp.sum(out_auto.reshape(N, -1) ** 2, axis=1))
    assert bool(jnp.all(jnp.abs(norms - 1.0) < 1e-2))
    print("KERNEL_OK")
</pallas_src>

<mosaic_0001>
module attributes {stable_mosaic.version = 11 : i64} {
  func.func @kernel(%arg0: i32, %arg1: i32, %arg2: memref<1x32x256xbf16, #tpu.memory_space<vmem>>, %arg3: memref<8x32xf32, #tpu.memory_space<vmem>>, %arg4: memref<8x1xf32, #tpu.memory_space<vmem>>, %arg5: memref<8x32xf32, #tpu.memory_space<vmem>>, %arg6: memref<1x8x32xf32, #tpu.memory_space<vmem>>, %arg7: memref<8x32xf32, #tpu.memory_space<vmem>>, %arg8: memref<8x1xf32, #tpu.memory_space<vmem>>) attributes {dimension_semantics = [#tpu.dimension_semantics<parallel>, #tpu.dimension_semantics<arbitrary>], iteration_bounds = array<i64: 2, 1>, scalar_prefetch = 0 : i64, scratch_operands = 2 : i64, tpu.core_type = #tpu.core_type<tc>, window_params = [{transform_indices = @transform_0, window_bounds = array<i64: 1, 32, 256>}, {pipeline_mode = #tpu.pipeline_mode<synchronous>, transform_indices = @transform_1, window_bounds = array<i64: 8, 32>}, {pipeline_mode = #tpu.pipeline_mode<synchronous>, transform_indices = @transform_2, window_bounds = array<i64: 8, 1>}, {pipeline_mode = #tpu.pipeline_mode<synchronous>, transform_indices = @transform_3, window_bounds = array<i64: 8, 32>}, {transform_indices = @transform_4, window_bounds = array<i64: 1, 8, 32>}]} {
    %c0_i32 = arith.constant 0 : i32
    %0 = arith.cmpi eq, %arg1, %c0_i32 : i32
    %1 = arith.extui %0 : i1 to i32
    %c0_i32_0 = arith.constant 0 : i32
    %2 = arith.cmpi ne, %1, %c0_i32_0 : i32
    scf.if %2 {
      %cst_24 = arith.constant 0.000000e+00 : f32
      %52 = vector.broadcast %cst_24 : f32 to vector<8x32xf32>
      %c0_25 = arith.constant 0 : index
      %c0_26 = arith.constant 0 : index
      %53 = vector.load %arg7[%c0_25, %c0_26] : memref<8x32xf32, #tpu.memory_space<vmem>>, vector<8x32xf32>
      tpu.vector_store %arg7[%c0_25, %c0_26], %52 {strides = array<i32>} : memref<8x32xf32, #tpu.memory_space<vmem>>, vector<8x32xf32>,
      %cst_27 = arith.constant 0.000000e+00 : f32
      %54 = vector.broadcast %cst_27 : f32 to vector<8x1xf32>
      %c0_28 = arith.constant 0 : index
      %c0_29 = arith.constant 0 : index
      %55 = vector.load %arg8[%c0_28, %c0_29] : memref<8x1xf32, #tpu.memory_space<vmem>>, vector<8x1xf32>
      tpu.vector_store %arg8[%c0_28, %c0_29], %54 {strides = array<i32>} : memref<8x1xf32, #tpu.memory_space<vmem>>, vector<8x1xf32>,
    } else {
    }
    %c0 = arith.constant 0 : index
    %c0_1 = arith.constant 0 : index
    %c0_2 = arith.constant 0 : index
    %3 = vector.load %arg2[%c0, %c0_1, %c0_2] : memref<1x32x256xbf16, #tpu.memory_space<vmem>>, vector<1x32x256xbf16>
    %4 = vector.shape_cast %3 : vector<1x32x256xbf16> to vector<32x256xbf16>
    %5 = arith.extf %4 : vector<32x256xbf16> to vector<32x256xf32>
    %6 = arith.mulf %5, %5 : vector<32x256xf32>
    %cst = arith.constant dense<0.000000e+00> : vector<256xf32>
    %7 = vector.multi_reduction <add>, %6, %cst [0] : vector<32x256xf32> to vector<256xf32>
    %8 = vector.shape_cast %7 : vector<256xf32> to vector<1x256xf32>
    %cst_3 = arith.constant 1.000000e-24 : f32
    %9 = vector.broadcast %cst_3 : f32 to vector<1x256xf32>
    %10 = arith.maximumf %8, %9 : vector<1x256xf32>
    %11 = math.rsqrt %10 : vector<1x256xf32>
    %c0_4 = arith.constant 0 : index
    %c0_5 = arith.constant 0 : index
    %12 = vector.load %arg3[%c0_4, %c0_5] : memref<8x32xf32, #tpu.memory_space<vmem>>, vector<8x32xf32>
    %cst_6 = arith.constant dense<0.000000e+00> : vector<8x256xf32>
    %13 = tpu.matmul %12, %5, %cst_6 {dimension_numbers = #tpu.dot_dimension_numbers<[1], [0], [0], [1], [0, 0, 1, 1], [], []>} : vector<8x32xf32>, vector<32x256xf32>, vector<8x256xf32> -> vector<8x256xf32>
    %14 = vector.broadcast %11 : vector<1x256xf32> to vector<8x256xf32>
    %15 = arith.mulf %13, %14 : vector<8x256xf32>
    %c0_7 = arith.constant 0 : index
    %c0_8 = arith.constant 0 : index
    %16 = vector.load %arg4[%c0_7, %c0_8] : memref<8x1xf32, #tpu.memory_space<vmem>>, vector<8x1xf32>
    %17 = vector.broadcast %16 : vector<8x1xf32> to vector<8x256xf32>
    %18 = arith.addf %15, %17 : vector<8x256xf32>
    %cst_9 = arith.constant dense<0xFF800000> : vector<256xf32>
    %19 = vector.multi_reduction <maximumf>, %18, %cst_9 [0] : vector<8x256xf32> to vector<256xf32>
    %20 = vector.shape_cast %19 : vector<256xf32> to vector<1x256xf32>
    %21 = vector.broadcast %20 : vector<1x256xf32> to vector<8x256xf32>
    %22 = arith.subf %18, %21 : vector<8x256xf32>
    %23 = math.exp %22 : vector<8x256xf32>
    %cst_10 = arith.constant dense<0.000000e+00> : vector<256xf32>
    %24 = vector.multi_reduction <add>, %23, %cst_10 [0] : vector<8x256xf32> to vector<256xf32>
    %25 = vector.shape_cast %24 : vector<256xf32> to vector<1x256xf32>
    %26 = tpu.reciprocal %25 {approx = true} : vector<1x256xf32> -> vector<1x256xf32>
    %27 = vector.broadcast %26 : vector<1x256xf32> to vector<8x256xf32>
    %28 = arith.mulf %23, %27 : vector<8x256xf32>
    %29 = tpu.iota {dimensions = array<i32: 1>} : vector<8x256xi32>
    %c256_i32 = arith.constant 256 : i32
    %30 = arith.muli %arg1, %c256_i32 : i32
    %31 = vector.broadcast %30 : i32 to vector<8x256xi32>
    %32 = arith.addi %29, %31 : vector<8x256xi32>
    %c196_i32 = arith.constant 196 : i32
    %33 = vector.broadcast %c196_i32 : i32 to vector<8x256xi32>
    %34 = arith.cmpi slt, %32, %33 : vector<8x256xi32>
    %cst_11 = arith.constant 0.000000e+00 : f32
    %35 = vector.broadcast %cst_11 : f32 to vector<8x256xf32>
    %36 = arith.select %34, %28, %35 : vector<8x256xi1>, vector<8x256xf32>
    %c0_12 = arith.constant 0 : index
    %c0_13 = arith.constant 0 : index
    %37 = vector.load %arg8[%c0_12, %c0_13] : memref<8x1xf32, #tpu.memory_space<vmem>>, vector<8x1xf32>
    %cst_14 = arith.constant dense<0.000000e+00> : vector<8xf32>
    %38 = vector.multi_reduction <add>, %36, %cst_14 [1] : vector<8x256xf32> to vector<8xf32>
    %39 = vector.shape_cast %38 : vector<8xf32> to vector<8x1xf32>
    %40 = arith.addf %37, %39 : vector<8x1xf32>
    %c0_15 = arith.constant 0 : index
    %c0_16 = arith.constant 0 : index
    %41 = vector.load %arg8[%c0_15, %c0_16] : memref<8x1xf32, #tpu.memory_space<vmem>>, vector<8x1xf32>
    tpu.vector_store %arg8[%c0_15, %c0_16], %40 {strides = array<i32>} : memref<8x1xf32, #tpu.memory_space<vmem>>, vector<8x1xf32>,
    %42 = vector.broadcast %11 : vector<1x256xf32> to vector<8x256xf32>
    %43 = arith.mulf %36, %42 : vector<8x256xf32>
    %c0_17 = arith.constant 0 : index
    %c0_18 = arith.constant 0 : index
    %44 = vector.load %arg7[%c0_17, %c0_18] : memref<8x32xf32, #tpu.memory_space<vmem>>, vector<8x32xf32>
    %45 = arith.truncf %43 : vector<8x256xf32> to vector<8x256xbf16>
    %cst_19 = arith.constant dense<0.000000e+00> : vector<8x32xf32>
    %46 = tpu.matmul %45, %4, %cst_19 {dimension_numbers = #tpu.dot_dimension_numbers<[1], [1], [0], [0], [0, 0, 1, 0], [], []>} : vector<8x256xbf16>, vector<32x256xbf16>, vector<8x32xf32> -> vector<8x32xf32>
    %47 = arith.addf %44, %46 : vector<8x32xf32>
    %c0_20 = arith.constant 0 : index
    %c0_21 = arith.constant 0 : index
    %48 = vector.load %arg7[%c0_20, %c0_21] : memref<8x32xf32, #tpu.memory_space<vmem>>, vector<8x32xf32>
    tpu.vector_store %arg7[%c0_20, %c0_21], %47 {strides = array<i32>} : memref<8x32xf32, #tpu.memory_space<vmem>>, vector<8x32xf32>,
    %c0_i32_22 = arith.constant 0 : i32
    %49 = arith.cmpi eq, %arg1, %c0_i32_22 : i32
    %50 = arith.extui %49 : i1 to i32
    %c0_i32_23 = arith.constant 0 : i32
    %51 = arith.cmpi ne, %50, %c0_i32_23 : i32
    scf.if %51 {
      %c0_24 = arith.constant 0 : index
      %c0_25 = arith.constant 0 : index
      %52 = vector.load %arg7[%c0_24, %c0_25] : memref<8x32xf32, #tpu.memory_space<vmem>>, vector<8x32xf32>
      %c0_26 = arith.constant 0 : index
      %c0_27 = arith.constant 0 : index
      %53 = vector.load %arg5[%c0_26, %c0_27] : memref<8x32xf32, #tpu.memory_space<vmem>>, vector<8x32xf32>
      %c0_28 = arith.constant 0 : index
      %c0_29 = arith.constant 0 : index
      %54 = vector.load %arg8[%c0_28, %c0_29] : memref<8x1xf32, #tpu.memory_space<vmem>>, vector<8x1xf32>
      %55 = vector.broadcast %54 : vector<8x1xf32> to vector<8x32xf32>
      %56 = arith.mulf %53, %55 : vector<8x32xf32>
      %57 = arith.subf %52, %56 : vector<8x32xf32>
      %58 = arith.mulf %57, %57 : vector<8x32xf32>
      %cst_30 = arith.constant dense<0.000000e+00> : vector<8xf32>
      %59 = vector.multi_reduction <add>, %58, %cst_30 [1] : vector<8x32xf32> to vector<8xf32>
      %60 = vector.shape_cast %59 : vector<8xf32> to vector<8x1xf32>
      %cst_31 = arith.constant 1.000000e-24 : f32
      %61 = vector.broadcast %cst_31 : f32 to vector<8x1xf32>
      %62 = arith.maximumf %60, %61 : vector<8x1xf32>
      %63 = math.rsqrt %62 : vector<8x1xf32>
      %64 = vector.broadcast %63 : vector<8x1xf32> to vector<8x32xf32>
      %65 = arith.mulf %57, %64 : vector<8x32xf32>
      %66 = arith.mulf %65, %65 : vector<8x32xf32>
      %cst_32 = arith.constant dense<0.000000e+00> : vector<8xf32>
      %67 = vector.multi_reduction <add>, %66, %cst_32 [1] : vector<8x32xf32> to vector<8xf32>
      %68 = vector.shape_cast %67 : vector<8xf32> to vector<8x1xf32>
      %cst_33 = arith.constant dense<0.000000e+00> : vector<1xf32>
      %69 = vector.multi_reduction <add>, %68, %cst_33 [0] : vector<8x1xf32> to vector<1xf32>
      %70 = vector.shape_cast %69 : vector<1xf32> to vector<1x1xf32>
      %cst_34 = arith.constant 1.000000e-24 : f32
      %71 = vector.broadcast %cst_34 : f32 to vector<1x1xf32>
      %72 = arith.maximumf %70, %71 : vector<1x1xf32>
      %73 = math.rsqrt %72 : vector<1x1xf32>
      %74 = vector.broadcast %73 : vector<1x1xf32> to vector<8x32xf32>
      %75 = arith.mulf %65, %74 : vector<8x32xf32>
      %c0_35 = arith.constant 0 : index
      %c0_36 = arith.constant 0 : index
      %c0_37 = arith.constant 0 : index
      %76 = vector.load %arg6[%c0_35, %c0_36, %c0_37] : memref<1x8x32xf32, #tpu.memory_space<vmem>>, vector<1x8x32xf32>
      %77 = vector.shape_cast %76 : vector<1x8x32xf32> to vector<8x32xf32>
      %78 = vector.shape_cast %75 : vector<8x32xf32> to vector<1x8x32xf32>
      tpu.vector_store %arg6[%c0_35, %c0_36, %c0_37], %78 {strides = array<i32>} : memref<1x8x32xf32, #tpu.memory_space<vmem>>, vector<1x8x32xf32>,
    } else {
    }
    return
  }
  func.func @transform_0(%arg0: i32, %arg1: i32) -> (i32, i32, i32) {
    %c0_i32 = arith.constant 0 : i32
    %c0_i32_0 = arith.constant 0 : i32
    return %arg0, %c0_i32, %arg1 : i32, i32, i32
  }
  func.func @transform_1(%arg0: i32, %arg1: i32) -> (i32, i32) {
    %c0_i32 = arith.constant 0 : i32
    %c0_i32_0 = arith.constant 0 : i32
    %c0_i32_1 = arith.constant 0 : i32
    return %c0_i32, %c0_i32_0 : i32, i32
  }
  func.func @transform_2(%arg0: i32, %arg1: i32) -> (i32, i32) {
    %c0_i32 = arith.constant 0 : i32
    %c0_i32_0 = arith.constant 0 : i32
    %c0_i32_1 = arith.constant 0 : i32
    return %c0_i32, %c0_i32_0 : i32, i32
  }
  func.func @transform_3(%arg0: i32, %arg1: i32) -> (i32, i32) {
    %c0_i32 = arith.constant 0 : i32
    %c0_i32_0 = arith.constant 0 : i32
    %c0_i32_1 = arith.constant 0 : i32
    return %c0_i32, %c0_i32_0 : i32, i32
  }
  func.func @transform_4(%arg0: i32, %arg1: i32) -> (i32, i32, i32) {
    %c0_i32 = arith.constant 0 : i32
    %c0_i32_0 = arith.constant 0 : i32
    %c0_i32_1 = arith.constant 0 : i32
    return %arg0, %c0_i32, %c0_i32_0 : i32, i32, i32
  }
}

</mosaic_0001>

<bundles_post_ra>
// kernel: tpu_custom_call.1
= control target key start
LH: loop header
LB: loop body
LE: loop exit
PB: predicated region body
PF: predicated region fallthrough
CT: control target
= control target key end

     0   :  { %9 = vsyncpa [#allocation5], 0  ;;  %s1097_s0 = inlined_call_operand.hbm [shape: bf16[2,32,256], index: 0, kind: input, shape index: {}]   ;;  %s1098_s1 = inlined_call_operand.vmem [shape: f32[8,32], index: 1, kind: input, shape index: {}]   ;;  %s1099_s2 = inlined_call_operand.vmem [shape: f32[8,1], index: 2, kind: input, shape index: {}]   ;;  %s1100_s3 = inlined_call_operand.vmem [shape: f32[8,32], index: 3, kind: input, shape index: {}]   ;;  %s1101_s4 = inlined_call_operand.hbm [shape: f32[2,8,32], index: 4, kind: output, shape index: {}]  }
   0x1   :  { %11 = vsyncpa [#allocation5 + $0x1], 0 }
   0x2   :  { %12 = vsyncpa [#allocation6], 0 }
   0x3   :  { %14 = vsyncpa [#allocation6 + $0x1], 0  ;;  %s904_s15 = smov 0   ;;  %s906_s16 = smov 0  }
   0x4   :  { %s908_s17 = smov 0   ;;  %s910_s18 = smov 0  }
   0x5   :  { %s912_s19 = smov 0   ;;  %s914_s20 = smov 0  }
   0x6 LB: > { %s618_s21 = sadd.s32 4294967295, %s870_s20   ;;  %s619_s22 = sadd.s32 4294967294, %s870_s20   ;;  %s870_s20 = sphi %s914_s20, %s20_s20   ;;  %s866_s19 = sphi %s912_s19, %s1116_s19   ;;  %s862_s18 = sphi %s910_s18, %s1115_s18   ;;  %s858_s17 = sphi %s908_s17, %s1114_s17   ;;  %s854_s16 = sphi %s906_s16, %s1113_s16   ;;  %s850_s15 = sphi %s904_s15, %s1112_s15  }
   0x7   : > { %s32_s23 = sadd.s32 1, %s866_s19  ;;  %s41_s24 = sadd.s32 1, %s858_s17 }
   0x8   : > { %p34_p0 = scmp.ge.s32.totalorder %s32_s23, 2  ;;  %p48_p1 = scmp.ne.s32.totalorder %s858_s17, %s854_s16 }
   0x9   : > { %p49_p2 = scmp.eq.s32.totalorder %s870_s20, 0  ;;  %p54_p3 = scmp.ne.s32.totalorder %s854_s16, %s850_s15 }
   0xa   : > { %s1118_s23 = smov (%p34_p0, %s32_s23), 0  ;;  %p55_p5 = scmp.eq.s32.totalorder %s618_s21, 0 }
   0xb   : > { %p945_p4 = por %p49_p2, %p48_p1  ;;  %s36_s26 = ssub.s32 %s866_s19, %s1118_s23 }
   0xc   : > { %p141_p6 = scmp.eq.s32.totalorder %s618_s21, 1  ;;  %p39_p7 = scmp.eq.s32.totalorder %s36_s26, 0 }
   0xd   : > { %p951_p8 = por %p55_p5, %p54_p3  ;;  %p147_p10 = scmp.eq.s32.totalorder %s619_s22, 1 }
   0xe   : > { %p955_p9 = por %p141_p6, %p48_p1  ;;  %p662_p13 = scmp.lt.s32.totalorder %s870_s20, 2 }
   0xf   : > { %s960_s29 = scalar_select %p39_p7, %s858_s17, %s41_s24  }
  0x10   : > { %s1105_s28 = scalar_select %p955_p9, 1, 0 }
  0x11   : > { %p962_p11 = por %p147_p10, %p54_p3  ;;  %s176_s5 = sand.u32 1, %s858_s17  }
  0x12   : > { %s622_s6 = sshll.u32 %s176_s5, 5  ;;  %s637_s7 = sshll.u32 %s866_s19, 9 }
  0x13   : > { %s1106_s30 = scalar_select %p962_p11, 1, 0 }
  0x14   : > { %s973_s10 = scalar_lea.hbm %s1097_s0, %s637_s7  ;;  %s180_s11 = scalar_lea.vmem [#allocation4], %s622_s6 }
  0x15   : > { %s189_s12 = sshll.u32 %s180_s11, 4  ;;  %p979_p0 = pnand %p662_p13, %p945_p4  ;;  %s975_s12 = int_to_ptr.vmem [resolvable:$true] %s189_s12 }
  0x16   : > { %s984_s14 = scalar_lea.sflag [#allocation5], %s176_s5  ;;  %s738_s21 = scalar_lea.hbm %s973_s10, 512 }
  0x17   : > { %p739_p2 = scmp.ne.s32.totalorder %s973_s10, %s738_s21  ;;  %p740_p3 = pneg %p979_p0 }
  0x18   : > { %s743_s25 = scalar_lea.hbm %s1097_s0, 1024  ;;  %p744_p4 = scmp.lt.u32.totalorder %s973_s10, %s1097_s0 }
  0x19   : > { %p741_p5 = pnand %p740_p3, %p739_p2  ;;  %p745_p7 = scmp.lt.u32.totalorder %s743_s25, %s738_s21 }
  0x1a   : > { %p747_p13 = scmp.lt.u32.totalorder %s738_s21, %s973_s10 }
  0x1b   : > { %p742_p6 = pneg %p741_p5  ;;  %p746_p10 = por %p745_p7, %p744_p4 }
  0x1d   : > { %p748_p12 = por %p747_p13, %p746_p10 }
  0x1f   : > { %p749_p1 = pnand %p748_p12, %p742_p6 }
  0x21   : > { %752 = shalt.err (!%p749_p1)
}
  0x22   : > { %s753_s5 = scalar_lea.vmem %s975_s12, 512  ;;  %s872_s7 = smov [#allocation4]  }
  0x23   : > { %p754_p2 = scmp.ne.s32.totalorder %s975_s12, %s753_s5  ;;  %s758_s8 = sshll.u32 %s872_s7, 4  ;;  %s759_s8 = int_to_ptr.vmem [resolvable:$false] %s758_s8 }
  0x24   : > { %s760_s9 = scalar_lea.vmem %s759_s8, 1024  ;;  %p761_p9 = scmp.lt.s32.totalorder %s975_s12, %s759_s8 }
  0x25   : > { %p756_p5 = pnand %p754_p2, %p740_p3  ;;  %p762_p4 = scmp.lt.s32.totalorder %s760_s9, %s753_s5 }
  0x27   : > { %p757_p11 = pneg %p756_p5  ;;  %p763_p7 = por %p762_p4, %p761_p9 }
  0x29   : > { %p764_p10 = pnand %p763_p7, %p757_p11 }
  0x2b   : > { %767 = shalt.err (!%p764_p10)
}
  0x2c   : > { %s873_s11 = smov 128   ;;  %s874_s21 = smov 8  }
  0x2d   : > { %657 = dma.hbm_to_vmem [thread:$0]  (!%p979_p0), %s973_s10, 512, %s975_s12, %s984_s14, %s873_s11, %s873_s11, %s874_s21  }
  0x2e   : > { %p197_p12 = scmp.lt.s32.totalorder %s870_s20, 3  ;;  %p1108_p1 = scmp.ge.s32.totalorder %s870_s20, 1 }
  0x30   : > { %p198_p3 = pnand %p1108_p1, %p197_p12 }
  0x31   : > { %s1016_s22 = sand.u32 (!%p198_p3), 1, %s854_s16  }
  0x32   : > { %201 = sbr.rel (%p198_p3) target bundleno = 972 (0x3cc), region = 36  ;;  %s626_s24 = sshll.u32 (!%p198_p3), %s1016_s22, 5 }
  0x33   : > { %s204_s25 = scalar_lea.sflag (!%p198_p3), [#allocation5], %s1016_s22  ;;  %s207_s26 = scalar_lea.vmem (!%p198_p3), [#allocation4], %s626_s24 }
  0x39   : > { %821 = dma.done.wait (%p951_p8), %s204_s25, 512  }
  0x3a   : > { %823 = vsyncadd (%p951_p8), %s204_s25, 4294966784  ;;  %vm238_vm0 = vcmask 261120   ;;  %vm240_vm1 = vcmask 7168   ;;  %v875_v0 = vmov 0.0   ;;  %v876_v1 = vmov 0   ;;  %v242_v2 = vld [vmem:[%s207_s26] sm:$0xff] }
  0x3b   : > { %239 = vst.msk [vmem:[#allocation2] sm:$0xff] %vm238_vm0, %v875_v0  ;;  %353 = vmatprep.mubr.f32.mxu0 %v875_v0  ;;  %716 = vset.pattern.permute.xlu0 %v876_v1  ;;  %v243_v3 = vld [vmem:[%s207_s26 + $0x8] sm:$0xff]  ;;  %v244_v4 = vld [vmem:[%s207_s26 + $0x10] sm:$0xff]  ;;  %v245_v8 = vld [vmem:[%s207_s26 + $0x18] sm:$0xff]  ;;  %828 = vmul.bf16.f32.vacc0 %v242_v2, %v242_v2  ;;  %v877_v15 = vmov 1935823168   ;;  %v838_v18 = vlaneseq }
  0x3c   : > { %241 = vst.msk [vmem:[#allocation3] sm:$0xff] %vm240_vm1, %v875_v0  ;;  %717 = vset.pattern.permute.xlu1 %v876_v1  ;;  %v362_v5 = vld [vmem:[%s1099_s2] sm:$0xff]  ;;  %v646_v6 = vcombine.high %v242_v2, %v243_v3  ;;  %v647_v7 = vcombine.low %v242_v2, %v243_v3  ;;  %829 = vmac.bf16.f32.vacc0 %v243_v3, %v243_v3  ;;  %v836_v16 = vunpack.c.l.s4 %v877_v15  ;;  %s627_s5 = sshll.u32 %s1016_s22, 3  ;;  %s634_s7 = sshll.u32 %s862_s18, 7 }
  0x3d   : > { %365 = vperm.xlu0 %716, %v362_v5   ;;  %v648_v9 = vcombine.high %v244_v4, %v245_v8  ;;  %v649_v10 = vcombine.low %v244_v4, %v245_v8  ;;  %830 = vmac.bf16.f32.vacc0 %v244_v4, %v244_v4  ;;  %v839_v19 = vshrl.u32 %v838_v18, 7  ;;  %v284_v23 = vld [vmem:[%s1098_s1] sm:$0xff]  ;;  %s231_s8 = scalar_lea.vmem [#allocation7], %s627_s5  ;;  %s1047_s24 = scalar_lea.hbm %s1101_s4, %s634_s7 }
  0x3e   : > { %639 = vmatprep.subr.bf16.mxu0 %v646_v6  ;;  %447 = vmatprep.subr.bf16.mxu1 %v646_v6  ;;  %831 = vmac.bf16.f32.vacc0 %v245_v8, %v245_v8  ;;  %v837_v17 = vunpack.c.0.s8 %v836_v16  ;;  %s537_s9 = sshll.u32 %s231_s8, 4  ;;  %s524_s25 = scalar_lea.sflag [#allocation6], %s1016_s22  ;;  %s1049_s9 = int_to_ptr.vmem [resolvable:$true] %s537_s9 }
  0x3f   : > { %641 = vmatpush1.bf16.msra.mxu0 %v647_v7  ;;  %448 = vmatpush1.bf16.xpose.msra.mxu1 %v647_v7  ;;  %s768_s26 = scalar_lea.vmem %s1049_s9, 128  ;;  %p1109_p9 = scmp.ne.s32.totalorder %s1105_s28, 0 }
  0x40   : > { %643 = vmatprep.subr.bf16.mxu0 %v648_v9  ;;  %449 = vmatprep.subr.bf16.mxu1 %v648_v9  ;;  %v832_v11 = vmovacc.add.low.vacc0  ;;  %v840_v20 = vsub.s32 %v837_v17, %v839_v19  ;;  %p769_p8 = scmp.ne.s32.totalorder %s1049_s9, %s768_s26  ;;  %s878_s18 = smov [#allocation7]  }
  0x41   : > { %v833_v12 = vmovacc.add.high.vacc0  ;;  %s772_s10 = sshll.u32 %s878_s18, 4  ;;  %s773_s10 = int_to_ptr.vmem [resolvable:$false] %s772_s10 }
  0x42   : > { %p770_p11 = pnand %p769_p8, %p1109_p9  ;;  %s774_s12 = scalar_lea.vmem %s773_s10, 256 }
  0x43   : > { %v834_v13 = vcombine.low %v832_v11, %v833_v12  ;;  %v835_v14 = vcombine.high %v832_v11, %v833_v12  ;;  %645 = vmatpush1.bf16.msra.mxu0 %v649_v10  ;;  %p775_p6 = scmp.lt.s32.totalorder %s1049_s9, %s773_s10  ;;  %p776_p13 = scmp.lt.s32.totalorder %s774_s12, %s768_s26 }
  0x44   : > { %p771_p0 = pneg %p770_p11 }
  0x45   : > { %v841_v21 = vrot.slane %v834_v13, %v840_v20  ;;  %v847_v22 = vrot.slane %v835_v14, %v840_v20  ;;  %v405_v13 = vand.u32 127, %v838_v18  ;;  %p777_p2 = por %p776_p13, %p775_p6 }
  0x46   : > { %628 = vmatmul.mubr.msk.f32.vlgmr.msra.gmra.mrb[0].mxu0 %vm238_vm0, %v284_v23 }
  0x47   : > { %450 = vmatpush1.bf16.xpose.msra.mxu1 %v649_v10  ;;  %v265_v24 = vrot.slane %v841_v21, 4  ;;  %v274_v25 = vrot.slane %v847_v22, 4  ;;  %v406_v14 = vadd.s32 128, %v405_v13  ;;  %p778_p5 = pnand %p777_p2, %p771_p0 }
  0x49   : > { %v266_v26 = vadd.f32 %v841_v21, %v265_v24  ;;  %v275_v27 = vadd.f32 %v847_v22, %v274_v25  ;;  %vm412_vm2 = vcmp.lt.s32.totalorder %v406_v14, 196 }
  0x4b   : > { %v267_v28 = vrot.slane %v266_v26, 2  ;;  %v276_v29 = vrot.slane %v275_v27, 2 }
  0x4d   : > { %v268_v30 = vadd.f32 %v267_v28, %v266_v26  ;;  %v277_v31 = vadd.f32 %v276_v29, %v275_v27  ;;  %v415_v26 = vld [vmem:[#allocation3] sm:$0xff]  ;;  %v424_v29 = vld [vmem:[#allocation2] sm:$0xff] }
  0x4f   : > { %v269_v32 = vrot.slane %v268_v30, 1  ;;  %v278_v33 = vrot.slane %v277_v31, 1 }
  0x51   : > { %v270_v34 = vadd.f32 %v269_v32, %v268_v30  ;;  %v279_v35 = vadd.f32 %v278_v33, %v277_v31 }
  0x53   : > { %v280_v36 = vmax.f32 %v270_v34, 1e-24  ;;  %v281_v37 = vmax.f32 %v279_v35, 1e-24  ;;  %v493_v35 = vld [vmem:[%s1100_s3] sm:$0xff] }
  0x55   : > { %722 = vrsqrt.f32 %v280_v36 }
  0x56   : > { %724 = vrsqrt.f32 %v281_v37 }
  0x5f   : > { %v723_v38 = vpop.eup %722 }
  0x60   : > { %v725_v39 = vpop.eup %724 }
  0xbc   : > { %v366_v41 = vpop.permute.xlu0 %365 }
 0x119   : > { %v355_v40 = vpop.f32.mrb[0].mxu0 }
 0x11a   : > { %v360_v42 = vmul.f32 %v723_v38, %v355_v40  ;;  %v357_v43 = vpop.f32.mrb[1].mxu0 }
 0x11b   : > { %v361_v44 = vmul.f32 %v725_v39, %v357_v43 }
 0x11c   : > { %v368_v45 = vadd.f32 %v366_v41, %v360_v42 }
 0x11d   : > { %v369_v46 = vadd.f32 %v366_v41, %v361_v44 }
 0x11e   : > { %v370_v47 = vrot.slane %v368_v45, 4 }
 0x11f   : > { %v376_v48 = vrot.slane %v369_v46, 4 }
 0x120   : > { %v371_v49 = vmax.f32 %v368_v45, %v370_v47 }
 0x121   : > { %v377_v50 = vmax.f32 %v369_v46, %v376_v48 }
 0x122   : > { %v372_v51 = vrot.slane %v371_v49, 2 }
 0x123   : > { %v378_v52 = vrot.slane %v377_v50, 2 }
 0x124   : > { %v373_v53 = vmax.f32 %v371_v49, %v372_v51 }
 0x125   : > { %v379_v54 = vmax.f32 %v377_v50, %v378_v52 }
 0x126   : > { %v374_v55 = vrot.slane %v373_v53, 1 }
 0x127   : > { %v380_v56 = vrot.slane %v379_v54, 1 }
 0x128   : > { %v375_v57 = vmax.f32 %v373_v53, %v374_v55 }
 0x129   : > { %v381_v58 = vmax.f32 %v379_v54, %v380_v56 }
 0x12a   : > { %v382_v59 = vsub.f32 %v368_v45, %v375_v57 }
 0x12b   : > { %v383_v60 = vsub.f32 %v369_v46, %v381_v58 }
 0x12c   : > { %v384_v61 = vmul.f32 1.442695, %v382_v59 }
 0x12d   : > { %v386_v62 = vmul.f32 1.442695, %v383_v60 }
 0x12e   : > { %726 = vpow2.f32 %v384_v61 }
 0x12f   : > { %728 = vpow2.f32 %v386_v62 }
 0x138   : > { %v727_v63 = vpop.eup %726 }
 0x139   : > { %v729_v0 = vpop.eup %728  ;;  %v388_v1 = vrot.slane %v727_v63, 4 }
 0x13a   : > { %v394_v2 = vrot.slane %v729_v0, 4 }
 0x13b   : > { %v389_v3 = vadd.f32 %v727_v63, %v388_v1 }
 0x13c   : > { %v395_v4 = vadd.f32 %v729_v0, %v394_v2 }
 0x13d   : > { %v390_v5 = vrot.slane %v389_v3, 2 }
 0x13e   : > { %v396_v6 = vrot.slane %v395_v4, 2 }
 0x13f   : > { %v391_v7 = vadd.f32 %v390_v5, %v389_v3 }
 0x140   : > { %v397_v8 = vadd.f32 %v396_v6, %v395_v4 }
 0x141   : > { %v392_v9 = vrot.slane %v391_v7, 1 }
 0x142   : > { %v398_v10 = vrot.slane %v397_v8, 1 }
 0x143   : > { %v393_v11 = vadd.f32 %v392_v9, %v391_v7 }
 0x144   : > { %v399_v12 = vadd.f32 %v398_v10, %v397_v8 }
 0x145   : > { %730 = vrcp.f32 %v393_v11 }
 0x146   : > { %732 = vrcp.f32 %v399_v12 }
 0x14f   : > { %v731_v15 = vpop.eup %730 }
 0x150   : > { %v733_v16 = vpop.eup %732  ;;  %v402_v17 = vmul.f32 %v731_v15, %v727_v63 }
 0x151   : > { %v403_v19 = vmul.f32 %v733_v16, %v729_v0 }
 0x152   : > { %v422_v20 = vmul.f32 %v723_v38, %v402_v17 }
 0x153   : > { %v414_v21 = vsel %vm412_vm2, %v403_v19, 0.0 }
 0x154   : > { %v416_v22 = vadd.f32 %v414_v21, %v402_v17  ;;  %v423_v23 = vmul.f32 %v725_v39, %v414_v21  ;;  %v425_v25 = vpack.c.bf16 %v422_v20, %v422_v20 }
 0x156   : > { %417 = vadd.xlane.f32.xlu0 %v416_v22  ;;  %v426_v24 = vpack.c.bf16 %v423_v23, %v423_v23 }
 0x158   : > { %479 = vmatprep.mubr.bf16.mxu1 %v426_v24 }
 0x159   : > { %480 = vmatmul.mubr.bf16.vlgmr.msra.gmra.mrb[0].mxu1 %v425_v25 }
 0x1e3   : > { %v418_v27 = vpop.xlane.xlu0 %417 }
 0x1e4   : > { %v419_v28 = vadd.f32 %v418_v27, %v415_v26 }
 0x1e6   : > { %421 = vst.msk [vmem:[#allocation3] sm:$0xff] %vm240_vm1, %v419_v28 }
 0x1ed   : > { %v494_v18 = vld [vmem:[#allocation3] sm:$0xff] }
 0x1ee   : > { %497 = vperm.xlu1 %717, %v494_v18  }
 0x22c   : > { %v481_v30 = vpop.f32.mrb[0].mxu1 }
 0x22d   : > { %v487_v31 = vadd.f32 %v481_v30, %v424_v29  ;;  %v483_v32 = vpop.f32.mrb[1].mxu1 }
 0x22e   : > { %v484_v33 = vpop.f32.mrb[2].mxu1 }
 0x22f   : > { %488 = vst.msk [vmem:[#allocation2] sm:$0xff] %vm238_vm0, %v487_v31  ;;  %v485_v34 = vpop.f32.mrb[3].mxu1 }
 0x236   : > { %v492_v38 = vld [vmem:[#allocation2] sm:$0xff] }
 0x26d   : > { %v498_v36 = vpop.permute.xlu1 %497 }
 0x26e   : > { %v500_v37 = vmul.f32 %v498_v36, %v493_v35 }
 0x270   : > { %v501_v39 = vsub.f32 %v492_v38, %v500_v37 }
 0x272   : > { %v502_v40 = vmul.f32 %v501_v39, %v501_v39 }
 0x274   : > { %v503_v41 = vsel %vm238_vm0, %v502_v40, 0.0 }
 0x275   : > { %504 = vadd.xlane.f32.xlu1 %v503_v41 }
 0x302   : > { %v505_v42 = vpop.xlane.xlu1 %504 }
 0x303   : > { %v506_v43 = vmax.f32 %v505_v42, 1e-24 }
 0x305   : > { %734 = vrsqrt.f32 %v506_v43 }
 0x30f   : > { %v735_v44 = vpop.eup %734 }
 0x310   : > { %v508_v45 = vmul.f32 %v735_v44, %v501_v39 }
 0x312   : > { %v509_v46 = vmul.f32 %v508_v45, %v508_v45 }
 0x314   : > { %v510_v47 = vsel %vm238_vm0, %v509_v46, 0.0 }
 0x315   : > { %511 = vadd.xlane.f32.xlu0 %v510_v47 }
 0x3a2   : > { %v512_v48 = vpop.xlane.xlu0 %511 }
 0x3a3   : > { %v513_v49 = vrot.slane %v512_v48, 4 }
 0x3a5   : > { %v514_v50 = vadd.f32 %v513_v49, %v512_v48 }
 0x3a7   : > { %v515_v51 = vrot.slane %v514_v50, 2 }
 0x3a9   : > { %v516_v52 = vadd.f32 %v515_v51, %v514_v50 }
 0x3ab   : > { %v517_v53 = vrot.slane %v516_v52, 1 }
 0x3ad   : > { %v518_v54 = vadd.f32 %v517_v53, %v516_v52 }
 0x3af   : > { %v519_v55 = vmax.f32 %v518_v54, 1e-24 }
 0x3b1   : > { %736 = vrsqrt.f32 %v519_v55 }
 0x3bb   : > { %v737_v56 = vpop.eup %736 }
 0x3bc   : > { %v521_v57 = vmul.f32 %v737_v56, %v508_v45 }
 0x3be   : > { %522 = vst.msk [vmem:[%s231_s8] sm:$0xff] %vm238_vm0, %v521_v57 }
 0x3bf   : > { %781 = shalt.err (!%p778_p5)
}
 0x3c0   : > { %s782_s22 = scalar_lea.hbm %s1047_s24, 128  ;;  %s786_s14 = scalar_lea.hbm %s1101_s4, 256 }
 0x3c1   : > { %p783_p4 = scmp.ne.s32.totalorder %s1047_s24, %s782_s22  ;;  %p787_p12 = scmp.lt.u32.totalorder %s1047_s24, %s1101_s4 }
 0x3c2   : > { %p788_p1 = scmp.lt.u32.totalorder %s786_s14, %s782_s22  ;;  %p790_p8 = scmp.lt.u32.totalorder %s782_s22, %s1047_s24 }
 0x3c3   : > { %p784_p7 = pnand %p783_p4, %p1109_p9 }
 0x3c4   : > { %p789_p3 = por %p788_p1, %p787_p12 }
 0x3c5   : > { %p785_p10 = pneg %p784_p7 }
 0x3c6   : > { %p791_p11 = por %p790_p8, %p789_p3 }
 0x3c8   : > { %p792_p0 = pnand %p791_p11, %p785_p10 }
 0x3ca   : > { %795 = shalt.err (!%p792_p0)
}
 0x3cb   : > { %652 = dma.vmem_to_hbm [thread:$0]  (%p1109_p9), %s1049_s9, 128, %s1047_s24, %s524_s25  }
 0x3cc PF: > { %s549_s7 = sand.u32 1, %s850_s15   ;;  %p1110_p6 = scmp.ne.s32.totalorder %s1106_s30, 0 }
 0x3cd   : > { %p1111_p13 = scmp.ge.s32.totalorder %s870_s20, 2  ;;  %s550_s8 = scalar_lea.sflag [#allocation6], %s549_s7 }
 0x3cf   : > { %p659_p2 = pnand %p1111_p13, %p1110_p6 }
 0x3d1   : > { %825 = dma.done.wait (!%p659_p2), %s550_s8, 128  }
 0x3d2   : > { %827 = vsyncadd (!%p659_p2), %s550_s8, 4294967168  ;;  %s20_s20 = sadd.s32 1, %s870_s20   ;;  %s1112_s15 = smov %s854_s16 }
 0x3d3   : > { %p17_p5 = scmp.ge.s32.totalorder %s20_s20, 4   ;;  %s1113_s16 = smov %s858_s17 }
 0x3d4   : > { %s1114_s17 = smov %s960_s29  ;;  %s1115_s18 = smov %s866_s19 }
 0x3d5   : > { %s1116_s19 = smov %s1118_s23  ;;  %19 = sbr.rel (!%p17_p5) target bundleno = 6 (0x6), region = 89 }
 0x3dc   :  { %555 = vsyncpa [#allocation5], 1 }
 0x3dd   :  { %557 = vsyncpa [#allocation5 + $0x1], 1 }
 0x3de   :  { %558 = vsyncpa [#allocation6], 1 }
 0x3df   :  { %560 = vsyncpa [#allocation6 + $0x1], 1 }

</bundles_post_ra>
